<compile_context>
chip_gen: v7x
topology: tpu7x:2x2x1
jax: 0.10.0
libtpu: 0.0.40
codegen_flags: <defaults>
</compile_context>

<pallas_src>
import jax
import jax.numpy as jnp
from jax.experimental import pallas as pl
from jax.experimental.pallas import tpu as pltpu


_LANE = 128
_MAX_TB = 32768  # batch-tile cap: ~200 B/lane live VMEM -> ~7 MiB at 32K lanes


def mlp_kernel(x_ref, w1_ref, b1_ref, w2_ref, b2_ref, w3_ref, b3_ref, o_ref):
    # x_ref: (2, TB)   w1_ref: (30, 2)   b1_ref: (30, 1)
    # w2_ref: (20, 30) b2_ref: (20, 1)
    # w3_ref: (20, 1)  b3_ref: (1, 1)    o_ref: (1, TB)
    x = x_ref[...]                                    # (2, TB)
    w1 = w1_ref[...]                                  # (30, 2)

    # Layer 1 (K=2): two broadcast multiply-adds on the VPU, no MXU padding.
    h1 = (w1[:, 0:1] * x[0:1, :]
          + w1[:, 1:2] * x[1:2, :]
          + b1_ref[...])                              # (30, TB)
    h1 = jnp.maximum(h1, 0.0)

    # Layer 2: dense enough for the MXU.  (20,30) @ (30,TB) -> (20,TB), f32 acc.
    h2 = jnp.dot(w2_ref[...], h1,
                 preferred_element_type=jnp.float32) + b2_ref[...]
    h2 = jnp.maximum(h2, 0.0)                         # (20, TB)

    # Layer 3 (single output row): weighted sum over 20 sublanes (VPU + XLU).
    h3 = jnp.sum(w3_ref[...] * h2, axis=0, keepdims=True) + b3_ref[...]  # (1, TB)

    # Sigmoid: exp on the EUP, no hand-rolled VPU divide.
    o_ref[...] = jax.nn.sigmoid(h3)


def _round_up(n, m):
    return ((n + m - 1) // m) * m


def network_model_circles_forward(x, params, max_tile=_MAX_TB):
    """x: (B, 2) float32, params in PyTorch layout (W: (out,in), b: (out,)).

    Returns (B, 1) float32, matching the PyTorch module's forward.
    """
    w1, b1, w2, b2, w3, b3 = params
    B = x.shape[0]

    # Kernel-friendly layouts: batch on lanes, biases as columns, W3 as (in, 1).
    xT = jnp.transpose(x)                     # (2, B) — fusable into the kernel input
    b1c = b1.reshape(30, 1)
    b2c = b2.reshape(20, 1)
    w3t = jnp.transpose(w3)                   # (20, 1)
    b3c = b3.reshape(1, 1)

    # Batch tile: lane-aligned and large (amortizes the ~0.35 us per-step
    # overhead), capped for VMEM, and sized so the grid keeps >= 2 steps when
    # B > 128 so the "parallel" axis can use both v7x TensorCores.
    if B <= _LANE:
        TB = B                                # block == full array dims
    else:
        TB = min(max_tile, _round_up(pl.cdiv(B, 2), _LANE))
    grid = (pl.cdiv(B, TB),)                  # ragged tail handled by masking

    out_t = pl.pallas_call(
        mlp_kernel,
        out_shape=jax.ShapeDtypeStruct((1, B), jnp.float32),
        grid=grid,
        in_specs=[
            pl.BlockSpec((2, TB), lambda i: (0, i)),        # x tile (pipelined)
            pl.BlockSpec((30, 2), lambda i: (0, 0)),        # W1   (VMEM-resident)
            pl.BlockSpec((30, 1), lambda i: (0, 0)),        # b1
            pl.BlockSpec((20, 30), lambda i: (0, 0)),       # W2
            pl.BlockSpec((20, 1), lambda i: (0, 0)),        # b2
            pl.BlockSpec((20, 1), lambda i: (0, 0)),        # W3^T
            pl.BlockSpec((1, 1), lambda i: (0, 0)),         # b3
        ],
        out_specs=pl.BlockSpec((1, TB), lambda i: (0, i)),  # lane-dense output
        compiler_params=pltpu.CompilerParams(
            dimension_semantics=("parallel",),
            vmem_limit_bytes=32 * 1024 * 1024,
            allow_input_fusion=[True, False, False, False, False, False, False],
        ),
    )(xT, w1, b1c, w2, b2c, w3t, b3c)

    # (1, B) -> (B, 1) is a pure reshape — no transpose/copy of the output.
    return out_t.reshape(B, 1)


def init_params(key):
    # PyTorch nn.Linear default init: U(-1/sqrt(fan_in), 1/sqrt(fan_in)),
    # weights stored (out, in), biases (out,) — exactly the module's layout.
    def linear_init(key, fan_in, fan_out):
        kw, kb = jax.random.split(key)
        bound = 1.0 / jnp.sqrt(fan_in)
        w = jax.random.uniform(kw, (fan_out, fan_in), jnp.float32, -bound, bound)
        b = jax.random.uniform(kb, (fan_out,), jnp.float32, -bound, bound)
        return w, b

    k1, k2, k3 = jax.random.split(key, 3)
    w1, b1 = linear_init(k1, 2, 30)
    w2, b2 = linear_init(k2, 30, 20)
    w3, b3 = linear_init(k3, 20, 1)
    return (w1, b1, w2, b2, w3, b3)


def reference_forward(x, params):
    w1, b1, w2, b2, w3, b3 = params
    h = jax.nn.relu(x @ w1.T + b1)
    h = jax.nn.relu(h @ w2.T + b2)
    return jax.nn.sigmoid(h @ w3.T + b3)


if __name__ == "__main__":
    key = jax.random.PRNGKey(0)
    kp, kx, kx2 = jax.random.split(key, 3)

    params = init_params(kp)

    # Small-shape check: batch=8, features=2 (single full block).
    x = jax.random.normal(kx, (8, 2), jnp.float32)
    out = jax.block_until_ready(network_model_circles_forward(x, params))
    ref = reference_forward(x, params)
    assert out.shape == (8, 1), out.shape
    assert jnp.allclose(out, ref, atol=1e-5, rtol=1e-5), (out, ref)

    # Multi-tile + ragged-tail check: batch=300 -> TB=256, grid=2, masked tail.
    x2 = jax.random.normal(kx2, (300, 2), jnp.float32)
    out2 = jax.block_until_ready(network_model_circles_forward(x2, params))
    ref2 = reference_forward(x2, params)
    assert out2.shape == (300, 1), out2.shape
    assert jnp.allclose(out2, ref2, atol=1e-5, rtol=1e-5)

    print("KERNEL_OK")
</pallas_src>

<mosaic_0001>
module attributes {stable_mosaic.version = 11 : i64} {
  func.func @mlp_kernel(%arg0: i32, %arg1: memref<2x8xf32, #tpu.memory_space<vmem>>, %arg2: memref<30x2xf32, #tpu.memory_space<vmem>>, %arg3: memref<30x1xf32, #tpu.memory_space<vmem>>, %arg4: memref<20x30xf32, #tpu.memory_space<vmem>>, %arg5: memref<20x1xf32, #tpu.memory_space<vmem>>, %arg6: memref<20x1xf32, #tpu.memory_space<vmem>>, %arg7: memref<1x1xf32, #tpu.memory_space<vmem>>, %arg8: memref<1x8xf32, #tpu.memory_space<vmem>>) attributes {dimension_semantics = [#tpu.dimension_semantics<parallel>], iteration_bounds = array<i64: 1>, scalar_prefetch = 0 : i64, scratch_operands = 0 : i64, tpu.core_type = #tpu.core_type<tc>, window_params = [{transform_indices = @transform_0, window_bounds = array<i64: 2, 8>}, {pipeline_mode = #tpu.pipeline_mode<synchronous>, transform_indices = @transform_1, window_bounds = array<i64: 30, 2>}, {pipeline_mode = #tpu.pipeline_mode<synchronous>, transform_indices = @transform_2, window_bounds = array<i64: 30, 1>}, {pipeline_mode = #tpu.pipeline_mode<synchronous>, transform_indices = @transform_3, window_bounds = array<i64: 20, 30>}, {pipeline_mode = #tpu.pipeline_mode<synchronous>, transform_indices = @transform_4, window_bounds = array<i64: 20, 1>}, {pipeline_mode = #tpu.pipeline_mode<synchronous>, transform_indices = @transform_5, window_bounds = array<i64: 20, 1>}, {pipeline_mode = #tpu.pipeline_mode<synchronous>, transform_indices = @transform_6, window_bounds = array<i64: 1, 1>}, {transform_indices = @transform_7, window_bounds = array<i64: 1, 8>}]} {
    %c0 = arith.constant 0 : index
    %c0_0 = arith.constant 0 : index
    %0 = vector.load %arg1[%c0, %c0_0] : memref<2x8xf32, #tpu.memory_space<vmem>>, vector<2x8xf32>
    %c0_1 = arith.constant 0 : index
    %c0_2 = arith.constant 0 : index
    %1 = vector.load %arg2[%c0_1, %c0_2] : memref<30x2xf32, #tpu.memory_space<vmem>>, vector<30x2xf32>
    %2 = vector.extract_strided_slice %1 {offsets = [0, 0], sizes = [30, 1], strides = [1, 1]} : vector<30x2xf32> to vector<30x1xf32>
    %3 = vector.extract_strided_slice %0 {offsets = [0, 0], sizes = [1, 8], strides = [1, 1]} : vector<2x8xf32> to vector<1x8xf32>
    %4 = vector.broadcast %2 : vector<30x1xf32> to vector<30x8xf32>
    %5 = vector.broadcast %3 : vector<1x8xf32> to vector<30x8xf32>
    %6 = arith.mulf %4, %5 : vector<30x8xf32>
    %7 = vector.extract_strided_slice %1 {offsets = [0, 1], sizes = [30, 1], strides = [1, 1]} : vector<30x2xf32> to vector<30x1xf32>
    %8 = vector.extract_strided_slice %0 {offsets = [1, 0], sizes = [1, 8], strides = [1, 1]} : vector<2x8xf32> to vector<1x8xf32>
    %9 = vector.broadcast %7 : vector<30x1xf32> to vector<30x8xf32>
    %10 = vector.broadcast %8 : vector<1x8xf32> to vector<30x8xf32>
    %11 = arith.mulf %9, %10 : vector<30x8xf32>
    %12 = arith.addf %6, %11 : vector<30x8xf32>
    %c0_3 = arith.constant 0 : index
    %c0_4 = arith.constant 0 : index
    %13 = vector.load %arg3[%c0_3, %c0_4] : memref<30x1xf32, #tpu.memory_space<vmem>>, vector<30x1xf32>
    %14 = vector.broadcast %13 : vector<30x1xf32> to vector<30x8xf32>
    %15 = arith.addf %12, %14 : vector<30x8xf32>
    %cst = arith.constant 0.000000e+00 : f32
    %16 = vector.broadcast %cst : f32 to vector<30x8xf32>
    %17 = arith.maximumf %15, %16 : vector<30x8xf32>
    %c0_5 = arith.constant 0 : index
    %c0_6 = arith.constant 0 : index
    %18 = vector.load %arg4[%c0_5, %c0_6] : memref<20x30xf32, #tpu.memory_space<vmem>>, vector<20x30xf32>
    %cst_7 = arith.constant dense<0.000000e+00> : vector<20x8xf32>
    %19 = tpu.matmul %18, %17, %cst_7 {dimension_numbers = #tpu.dot_dimension_numbers<[1], [0], [0], [1], [0, 0, 1, 1], [], []>} : vector<20x30xf32>, vector<30x8xf32>, vector<20x8xf32> -> vector<20x8xf32>
    %c0_8 = arith.constant 0 : index
    %c0_9 = arith.constant 0 : index
    %20 = vector.load %arg5[%c0_8, %c0_9] : memref<20x1xf32, #tpu.memory_space<vmem>>, vector<20x1xf32>
    %21 = vector.broadcast %20 : vector<20x1xf32> to vector<20x8xf32>
    %22 = arith.addf %19, %21 : vector<20x8xf32>
    %cst_10 = arith.constant 0.000000e+00 : f32
    %23 = vector.broadcast %cst_10 : f32 to vector<20x8xf32>
    %24 = arith.maximumf %22, %23 : vector<20x8xf32>
    %c0_11 = arith.constant 0 : index
    %c0_12 = arith.constant 0 : index
    %25 = vector.load %arg6[%c0_11, %c0_12] : memref<20x1xf32, #tpu.memory_space<vmem>>, vector<20x1xf32>
    %26 = vector.broadcast %25 : vector<20x1xf32> to vector<20x8xf32>
    %27 = arith.mulf %26, %24 : vector<20x8xf32>
    %cst_13 = arith.constant dense<0.000000e+00> : vector<8xf32>
    %28 = vector.multi_reduction <add>, %27, %cst_13 [0] : vector<20x8xf32> to vector<8xf32>
    %29 = vector.shape_cast %28 : vector<8xf32> to vector<1x8xf32>
    %c0_14 = arith.constant 0 : index
    %c0_15 = arith.constant 0 : index
    %30 = vector.load %arg7[%c0_14, %c0_15] : memref<1x1xf32, #tpu.memory_space<vmem>>, vector<1x1xf32>
    %31 = vector.broadcast %30 : vector<1x1xf32> to vector<1x8xf32>
    %32 = arith.addf %29, %31 : vector<1x8xf32>
    %33 = arith.negf %32 : vector<1x8xf32>
    %34 = math.exp %33 : vector<1x8xf32>
    %cst_16 = arith.constant 1.000000e+00 : f32
    %35 = vector.broadcast %cst_16 : f32 to vector<1x8xf32>
    %36 = arith.addf %35, %34 : vector<1x8xf32>
    %37 = arith.divf %35, %36 : vector<1x8xf32>
    %c0_17 = arith.constant 0 : index
    %c0_18 = arith.constant 0 : index
    %38 = vector.load %arg8[%c0_17, %c0_18] : memref<1x8xf32, #tpu.memory_space<vmem>>, vector<1x8xf32>
    tpu.vector_store %arg8[%c0_17, %c0_18], %37 {strides = array<i32>} : memref<1x8xf32, #tpu.memory_space<vmem>>, vector<1x8xf32>,
    return
  }
  func.func @transform_0(%arg0: i32) -> (i32, i32) {
    %c0_i32 = arith.constant 0 : i32
    %c0_i32_0 = arith.constant 0 : i32
    return %c0_i32, %arg0 : i32, i32
  }
  func.func @transform_1(%arg0: i32) -> (i32, i32) {
    %c0_i32 = arith.constant 0 : i32
    %c0_i32_0 = arith.constant 0 : i32
    %c0_i32_1 = arith.constant 0 : i32
    return %c0_i32, %c0_i32_0 : i32, i32
  }
  func.func @transform_2(%arg0: i32) -> (i32, i32) {
    %c0_i32 = arith.constant 0 : i32
    %c0_i32_0 = arith.constant 0 : i32
    %c0_i32_1 = arith.constant 0 : i32
    return %c0_i32, %c0_i32_0 : i32, i32
  }
  func.func @transform_3(%arg0: i32) -> (i32, i32) {
    %c0_i32 = arith.constant 0 : i32
    %c0_i32_0 = arith.constant 0 : i32
    %c0_i32_1 = arith.constant 0 : i32
    return %c0_i32, %c0_i32_0 : i32, i32
  }
  func.func @transform_4(%arg0: i32) -> (i32, i32) {
    %c0_i32 = arith.constant 0 : i32
    %c0_i32_0 = arith.constant 0 : i32
    %c0_i32_1 = arith.constant 0 : i32
    return %c0_i32, %c0_i32_0 : i32, i32
  }
  func.func @transform_5(%arg0: i32) -> (i32, i32) {
    %c0_i32 = arith.constant 0 : i32
    %c0_i32_0 = arith.constant 0 : i32
    %c0_i32_1 = arith.constant 0 : i32
    return %c0_i32, %c0_i32_0 : i32, i32
  }
  func.func @transform_6(%arg0: i32) -> (i32, i32) {
    %c0_i32 = arith.constant 0 : i32
    %c0_i32_0 = arith.constant 0 : i32
    %c0_i32_1 = arith.constant 0 : i32
    return %c0_i32, %c0_i32_0 : i32, i32
  }
  func.func @transform_7(%arg0: i32) -> (i32, i32) {
    %c0_i32 = arith.constant 0 : i32
    %c0_i32_0 = arith.constant 0 : i32
    return %c0_i32, %arg0 : i32, i32
  }
}

</mosaic_0001>

<bundles_post_ra>
// kernel: tpu_custom_call.1
= control target key start
LH: loop header
LB: loop body
LE: loop exit
PB: predicated region body
PF: predicated region fallthrough
CT: control target
= control target key end

     0   :  { %s515_s0 = inlined_call_operand.vmem [shape: f32[2,8], index: 0, kind: input, shape index: {}]   ;;  %s516_s1 = inlined_call_operand.vmem [shape: f32[30,2], index: 1, kind: input, shape index: {}]   ;;  %s517_s2 = inlined_call_operand.vmem [shape: f32[30,1], index: 2, kind: input, shape index: {}]   ;;  %s518_s3 = inlined_call_operand.vmem [shape: f32[20,30], index: 3, kind: input, shape index: {}]   ;;  %s519_s4 = inlined_call_operand.vmem [shape: f32[20,1], index: 4, kind: input, shape index: {}]   ;;  %s520_s5 = inlined_call_operand.vmem [shape: f32[20,1], index: 5, kind: input, shape index: {}]   ;;  %s521_s6 = inlined_call_operand.<no memory space> [shape: f32[1,1], index: 6, kind: input, shape index: {}]   ;;  %s522_s7 = inlined_call_operand.hbm [shape: f32[1,8], index: 7, kind: output, shape index: {}]  }
   0x1   :  { %v12_v0 = vstv %s521_s6 }
   0x2   :  { %13 = vst [vmem:[#allocation2] sm:$0x1] %v12_v0 }
   0x3   :  { %v32_v1 = vld [vmem:[%s516_s1 + $0x10] sm:$0xff]  ;;  %v30_v2 = vld [vmem:[%s516_s1] sm:$0xff]  ;;  %v388_v3 = vmov 1   ;;  %v31_v4 = vld [vmem:[%s516_s1 + $0x8] sm:$0xff] }
   0x4   :  { %356 = vset.pattern.permute.xlu0 %v388_v3  ;;  %354 = vset.pattern.permute.xlu1 %v388_v3 }
   0x5   :  { %71 = vperm.xlu0 %356, %v32_v1   ;;  %63 = vperm.xlu1 %354, %v30_v2  }
   0x6   :  { %14 = vsyncpa [#allocation4], 0  ;;  %v389_v5 = vmov 0   ;;  %v33_v6 = vld [vmem:[%s516_s1 + $0x18] sm:$0x3f]  ;;  %v91_v7 = vld [vmem:[%s517_s2 + $0x8] sm:$0xff]  ;;  %v54_v20 = vlaneseq }
   0x7   :  { %v90_v8 = vld [vmem:[%s517_s2] sm:$0xff]  ;;  %v92_v10 = vld [vmem:[%s517_s2 + $0x10] sm:$0xff]  ;;  %v93_v12 = vld [vmem:[%s517_s2 + $0x18] sm:$0x3f]  ;;  %v390_v13 = vmov 0.0|0.0   ;;  %vm391_vm0 = vmmov 0  }
   0x8   :  { %v125_v9 = vld [vmem:[%s519_s4] sm:$0xff]  ;;  %v127_v11 = vld [vmem:[%s519_s4 + $0x10] sm:$0xf]  ;;  %336 = vmatprep.subr.bf16.mxu0 %v390_v13  ;;  %343 = vmatprep.subr.bf16.mxu1 %v390_v13  ;;  %v241_v14 = vld [vmem:[%s520_s5 + $0x8] sm:$0xff]  ;;  %v392_v18 = vmov 0.0   ;;  %v482_v23 = vshrl.u32 %v54_v20, 7 }
   0x9   :  { %357 = vset.pattern.permute.xlu0 %v389_v5  ;;  %67 = vperm.xlu1 %354, %v31_v4   ;;  %v126_v15 = vld [vmem:[%s519_s4 + $0x8] sm:$0xff]  ;;  %v274_v16 = vld [vmem:[#allocation2] sm:$0x1]  ;;  %v242_v19 = vld [vmem:[%s520_s5 + $0x10] sm:$0xf]  ;;  %vm153_vm1 = vcmask 1045504  }
   0xa   :  { %36 = vperm.xlu0 %357, %v30_v2   ;;  %v240_v17 = vld [vmem:[%s520_s5] sm:$0xff]  ;;  %327 = vmatprep.mubr.msk.f32.mxu0 %vm391_vm0, %v392_v18  ;;  %v56_v26 = vsub.s32 0, %v482_v23  ;;  %v80_v27 = vsub.s32 1, %v482_v23  ;;  %vm393_vm2 = vmmov 1   ;;  %vm143_vm4 = vcmask 244736   ;;  %v123_v62 = vld [vmem:[%s518_s3 + $0x8] sm:$0xff] }
   0xb   :  { %330 = vmatprep.mubr.msk.f32.mxu1 %vm391_vm0, %v392_v18  ;;  %v29_v28 = vld [vmem:[%s515_s0] sm:$0x3]  ;;  %vm341_vm3 = vmpackc.low %vm153_vm1, %vm393_vm2  ;;  %v124_v63 = vld [vmem:[%s518_s3 + $0x10] sm:$0xf]  ;;  %vm261_vm5 = vcmask 64512   ;;  %vm265_vm6 = vcmask 60416  }
   0xc   :  { %v57_v31 = vrot.slane %v29_v28, %v56_v26  ;;  %v81_v32 = vrot.slane %v29_v28, %v80_v27  ;;  %v122_v61 = vld [vmem:[%s518_s3] sm:$0xff]  ;;  %s394_s3 = smov [#allocation3]   ;;  %vm291_vm7 = vcmask 57344  }
   0xd   :  { %355 = vset.pattern.permute.xlu1 %v389_v5  ;;  %s299_s9 = sshll.u32 %s394_s3, 4  ;;  %s300_s9 = int_to_ptr.vmem [resolvable:$true] %s299_s9 }
   0xe   :  { %41 = vperm.xlu0 %357, %v31_v4   ;;  %51 = vperm.xlu1 %355, %v33_v6   ;;  %s364_s10 = scalar_lea.vmem %s300_s9, 16  ;;  %s368_s11 = scalar_lea.vmem %s300_s9, 32 }
   0xf   :  { %p365_p0 = scmp.ne.s32.totalorder %s300_s9, %s364_s10  ;;  %p369_p1 = scmp.lt.s32.totalorder %s300_s9, %s300_s9 }
  0x10   :  { %p370_p2 = scmp.lt.s32.totalorder %s368_s11, %s364_s10 }
  0x12   :  { %46 = vperm.xlu0 %357, %v32_v1   ;;  %358 = vset.pattern.permute.xlu1 %v388_v3  ;;  %p371_p3 = por %p370_p2, %p369_p1 }
  0x13   :  { %75 = vperm.xlu1 %358, %v33_v6  }
  0x14   :  { %p372_p4 = pnand %p371_p3, %p365_p0 }
  0x16   :  { %101 = vperm.xlu0 %357, %v91_v7  }
  0x17   :  { %359 = vset.pattern.permute.xlu1 %v389_v5 }
  0x18   :  { %96 = vperm.xlu1 %359, %v90_v8  }
  0x1a   :  { %130 = vperm.xlu0 %357, %v125_v9  }
  0x1c   :  { %106 = vperm.xlu1 %359, %v92_v10  }
  0x1e   :  { %140 = vperm.xlu0 %357, %v127_v11  }
  0x20   :  { %111 = vperm.xlu1 %359, %v93_v12  }
  0x22   :  { %250 = vperm.xlu0 %357, %v241_v14  }
  0x24   :  { %135 = vperm.xlu1 %359, %v126_v15  }
  0x26   :  { %277 = vperm.xlu0 %357, %v274_v16  }
  0x28   :  { %245 = vperm.xlu1 %359, %v240_v17  }
  0x2c   :  { %255 = vperm.xlu1 %359, %v242_v19  }
  0x84   :  { %v64_v21 = vpop.permute.xlu1 %63  ;;  %v72_v22 = vpop.permute.xlu0 %71 }
  0x85   :  { %v82_v38 = vmul.f32 %v81_v32, %v64_v21  ;;  %v84_v46 = vmul.f32 %v81_v32, %v72_v22 }
  0x88   :  { %v68_v24 = vpop.permute.xlu1 %67 }
  0x89   :  { %v37_v25 = vpop.permute.xlu0 %36  ;;  %v83_v35 = vmul.f32 %v81_v32, %v68_v24 }
  0x8a   :  { %v58_v36 = vmul.f32 %v57_v31, %v37_v25 }
  0x8c   :  { %v86_v42 = vadd.f32 %v82_v38, %v58_v36 }
  0x8d   :  { %v42_v29 = vpop.permute.xlu0 %41  ;;  %v52_v30 = vpop.permute.xlu1 %51 }
  0x8e   :  { %v59_v33 = vmul.f32 %v57_v31, %v42_v29  ;;  %v61_v51 = vmul.f32 %v57_v31, %v52_v30 }
  0x90   :  { %v87_v39 = vadd.f32 %v83_v35, %v59_v33 }
  0x91   :  { %v47_v34 = vpop.permute.xlu0 %46 }
  0x92   :  { %v76_v37 = vpop.permute.xlu1 %75  ;;  %v60_v44 = vmul.f32 %v57_v31, %v47_v34 }
  0x93   :  { %v85_v47 = vmul.f32 %v81_v32, %v76_v37 }
  0x94   :  { %v88_v52 = vadd.f32 %v84_v46, %v60_v44 }
  0x95   :  { %v102_v40 = vpop.permute.xlu0 %101  ;;  %v89_v55 = vadd.f32 %v85_v47, %v61_v51 }
  0x96   :  { %v115_v41 = vadd.f32 %v102_v40, %v87_v39 }
  0x97   :  { %v97_v43 = vpop.permute.xlu1 %96 }
  0x98   :  { %v114_v45 = vadd.f32 %v97_v43, %v86_v42  ;;  %v119_v48 = vmax.f32 %v115_v41, 0.0 }
  0x99   :  { %v131_v0 = vpop.permute.xlu0 %130 }
  0x9a   :  { %v118_v49 = vmax.f32 %v114_v45, 0.0 }
  0x9b   :  { %v107_v50 = vpop.permute.xlu1 %106 }
  0x9c   :  { %v337_v53 = vpack.c.bf16 %v119_v48, %v118_v49  ;;  %v116_v54 = vadd.f32 %v107_v50, %v88_v52 }
  0x9d   :  { %v141_v2 = vpop.permute.xlu0 %140 }
  0x9e   :  { %338 = vmatpush3.bf16.msra.mxu0 %v337_v53  ;;  %345 = vmatpush3.bf16.msra.mxu1 %v337_v53  ;;  %v120_v58 = vmax.f32 %v116_v54, 0.0 }
  0x9f   :  { %v112_v56 = vpop.permute.xlu1 %111  ;;  %339 = vmatprep.subr.bf16.mxu0 %v390_v13  ;;  %344 = vmatprep.subr.bf16.mxu1 %v390_v13 }
  0xa0   :  { %v117_v57 = vadd.f32 %v112_v56, %v89_v55 }
  0xa1   :  { %v251_v12 = vpop.permute.xlu0 %250 }
  0xa2   :  { %v121_v59 = vmax.f32 %v117_v57, 0.0 }
  0xa3   :  { %v136_v1 = vpop.permute.xlu1 %135 }
  0xa4   :  { %v340_v60 = vpack.c.bf16 %v121_v59, %v120_v58 }
  0xa5   :  { %v278_v32 = vpop.permute.xlu0 %277 }
  0xa6   :  { %342 = vmatpush3.bf16.msk.msra.mxu0 %vm341_vm3, %v340_v60  ;;  %346 = vmatpush3.bf16.msk.msra.mxu1 %vm341_vm3, %v340_v60  ;;  %v283_v34 = vrot.slane %v278_v32, %v56_v26 }
  0xa7   :  { %v246_v9 = vpop.permute.xlu1 %245 }
  0xa9   :  { %328 = vmatmul.mubr.msk.f32.vlgmr.msra.gmra.mrb[0].mxu0 %vm143_vm4, %v122_v61  ;;  %331 = vmatmul.mubr.msk.f32.vlgmr.msra.gmra.mrb[0].mxu1 %vm143_vm4, %v123_v62 }
  0xaa   :  { %333 = vmatprep.mubr.msk.f32.mxu1 %vm391_vm0, %v392_v18 }
  0xab   :  { %v256_v21 = vpop.permute.xlu1 %255 }
  0xad   :  { %334 = vmatmul.mubr.msk.f32.gmra.mrb[2].mxu1 %vm143_vm4, %v124_v63 }
 0x17c   :  { %v223_v3 = vpop.f32.mrb[0].mxu0  ;;  %v228_v4 = vpop.f32.mrb[0].mxu1 }
 0x17d   :  { %v224_v5 = vadd.f32 %v223_v3, %v131_v0  ;;  %v229_v6 = vadd.f32 %v228_v4, %v136_v1  ;;  %v332_v7 = vpop.f32.mrb[1].mxu1  ;;  %v329_v8 = vpop.f32.mrb[1].mxu0 }
 0x17f   :  { %v237_v10 = vmax.f32 %v224_v5, 0.0  ;;  %v238_v11 = vmax.f32 %v229_v6, 0.0 }
 0x180   :  { %v233_v13 = vpop.f32.mrb[2].mxu1 }
 0x181   :  { %v258_v14 = vmul.f32 %v246_v9, %v237_v10  ;;  %v259_v15 = vmul.f32 %v251_v12, %v238_v11  ;;  %v234_v16 = vadd.f32 %v233_v13, %v141_v2  ;;  %v335_v17 = vpop.f32.mrb[3].mxu1 }
 0x183   :  { %v262_v18 = vsel %vm261_vm5, %v258_v14, 0.0  ;;  %v263_v19 = vsel %vm261_vm5, %v259_v15, 0.0  ;;  %v239_v20 = vmax.f32 %v234_v16, 0.0 }
 0x184   :  { %v264_v22 = vadd.f32 %v263_v19, %v262_v18 }
 0x185   :  { %v260_v24 = vmul.f32 %v256_v21, %v239_v20 }
 0x187   :  { %v266_v25 = vsel %vm265_vm6, %v260_v24, 0.0 }
 0x188   :  { %v267_v27 = vadd.f32 %v266_v25, %v264_v22 }
 0x18a   :  { %v268_v28 = vrot.slane %v267_v27, 4 }
 0x18c   :  { %v269_v29 = vadd.f32 %v268_v28, %v267_v27 }
 0x18e   :  { %v270_v30 = vrot.slane %v269_v29, 2 }
 0x190   :  { %v271_v31 = vadd.f32 %v270_v30, %v269_v29 }
 0x192   :  { %v272_v33 = vrot.slane %v271_v31, 1 }
 0x194   :  { %v273_v35 = vadd.f32 %v272_v33, %v271_v31 }
 0x196   :  { %v284_v36 = vadd.f32 %v283_v34, %v273_v35 }
 0x198   :  { %v311_v37 = vmul.f32 -1.442695, %v284_v36 }
 0x19a   :  { %360 = vpow2.f32 %v311_v37 }
 0x1a4   :  { %v361_v38 = vpop.eup %360 }
 0x1a5   :  { %v288_v39 = vadd.f32 1.0, %v361_v38 }
 0x1a7   :  { %362 = vrcp.f32 %v288_v39 }
 0x1b1   :  { %v363_v40 = vpop.eup %362 }
 0x1b2   :  { %292 = vst.msk [vmem:[#allocation3] sm:$0x1] %vm291_vm7, %v363_v40 }
 0x1b3   :  { %375 = shalt.err (!%p372_p4)
}
 0x1b4   :  { %s376_s14 = scalar_lea.hbm %s522_s7, 16 }
 0x1b5   :  { %p377_p5 = scmp.ne.s32.totalorder %s522_s7, %s376_s14  ;;  %p380_p6 = scmp.lt.u32.totalorder %s376_s14, %s522_s7 }
 0x1b7   :  { %p382_p7 = pnand %p380_p6, %p377_p5 }
 0x1b9   :  { %385 = shalt.err (!%p382_p7)
}
 0x1ba   :  { %302 = dma.vmem_to_hbm [thread:$0]  %s300_s9, 16, %s522_s7, [#allocation4]  }
 0x1bb   :  { %386 = dma.done.wait [#allocation4], 16  }
 0x1bc   :  { %387 = vsyncadd [#allocation4], 4294967280 }
 0x1bd   :  { %306 = vsyncpa [#allocation4], 1 }

</bundles_post_ra>
